<compile_context>
chip_gen: v7x
topology: tpu7x:2x2x1
jax: 0.10.0
libtpu: 0.0.40
codegen_flags: <defaults>
</compile_context>

<pallas_src>
import jax
import jax.numpy as jnp
from jax.experimental import pallas as pl
from jax.experimental.pallas import tpu as pltpu


def _round_up(n: int, m: int) -> int:
    return ((n + m - 1) // m) * m


def _fold_factor(d_model: int) -> int:
    return 128 // d_model if (d_model < 128 and 128 % d_model == 0) else 1


def fold_encoder_weights(w1, b1, w2, b2, dtype=jnp.float32):
    """Fold Linear(1,H) -> SiLU -> Linear(H,D) weights into block-diagonal form.

    Call once (outside any per-step solver loop) and pass the result to
    relative_positional_encoding(..., folded_weights=...).
    """
    H = w1.shape[-1]
    D = w2.shape[-1]
    F = _fold_factor(D)
    eyeF = jnp.eye(F, dtype=dtype)
    w1_f = jnp.kron(eyeF, w1.reshape(1, H).astype(dtype))      # (F, F*H)
    b1_f = jnp.tile(b1.reshape(1, H).astype(dtype), (1, F))    # (1, F*H)
    w2_f = jnp.kron(eyeF, w2.astype(dtype))                    # (F*H, F*D)
    b2_f = jnp.tile(b2.reshape(1, D).astype(dtype), (1, F))    # (1, F*D)
    return w1_f, b1_f, w2_f, b2_f


def _relpos_kernel(x_ref, t_ref, w1_ref, b1_ref, w2_ref, b2_ref, o_ref):
    # x_ref : (tm, F*D)   folded, lane-dense tile of x rows
    # t_ref : (tm, F)     F time values per folded row
    # w1_ref: (F, F*H)    block-diagonal fold of Linear(1 -> H) weight
    # b1_ref: (1, F*H)    tiled first bias
    # w2_ref: (F*H, F*D)  block-diagonal fold of Linear(H -> D) weight
    # b2_ref: (1, F*D)    tiled second bias
    t = t_ref[...]
    # Folded Linear(1 -> H).  (K=F matmul; a VPU broadcast-multiply would be
    # marginally cheaper on v5e, but the MXU push is free filler under DMA.)
    h = jnp.dot(t, w1_ref[...], preferred_element_type=jnp.float32) + b1_ref[...]
    h = h * jax.nn.sigmoid(h)                       # SiLU (sigmoid on EUP)
    # Folded Linear(H -> D): block-diagonal matmul emits the folded 128-lane
    # encoding directly.
    enc = jnp.dot(h.astype(w2_ref.dtype), w2_ref[...],
                  preferred_element_type=jnp.float32) + b2_ref[...]
    o_ref[...] = x_ref[...] + enc.astype(o_ref.dtype)


def relative_positional_encoding(x, times, w1=None, b1=None, w2=None, b2=None,
                                 *, tm=8192, folded_weights=None, in_place=False):
    """x: [B, S, D]; times: [B, S] or [S]; w1:(1,H) b1:(H,) w2:(H,D) b2:(D,).

    Pass folded_weights=fold_encoder_weights(...) to hoist the (tiny) weight
    folding out of a per-step loop; otherwise raw w1,b1,w2,b2 are folded here.
    """
    B, S, D = x.shape
    if folded_weights is None:
        folded_weights = fold_encoder_weights(w1, b1, w2, b2, dtype=x.dtype)
    w1_f, b1_f, w2_f, b2_f = folded_weights

    F = _fold_factor(D)
    Df = F * D
    Hf = w1_f.shape[-1]

    if times.ndim == 1:
        times = jnp.broadcast_to(times[None, :], (B, S))
    times = times.astype(x.dtype)

    N = B * S
    xf = x.reshape(N, D)
    tf = times.reshape(N, 1)

    # Fold F rows per 128-lane row.  Pads (a copy) only when N % F != 0;
    # callers that keep B*S a multiple of F pay zero pad/slice copies.
    pad_rows = (-N) % F
    if pad_rows:
        xf = jnp.pad(xf, ((0, pad_rows), (0, 0)))
        tf = jnp.pad(tf, ((0, pad_rows), (0, 0)))
    Nc = N + pad_rows
    Nf = Nc // F
    xff = xf.reshape(Nf, Df)           # lane-dense rows (last dim mult. of 128)
    tff = tf.reshape(Nf, F)

    itemsize = jnp.dtype(x.dtype).itemsize
    align = max(8, 32 // itemsize)     # sublane tile: 8 f32 / 16 bf16 / 32 int8

    # Row-tile selection:
    #  * keep >= ~4 grid steps when the array is big enough so the "parallel"
    #    grid axis can shard across v7x's two TensorCores,
    #  * cap by a VMEM budget (x + out + lane-padded t, double-buffered),
    #  * never below one sublane tile, never (much) above the array.
    four_step_cap = max(256, _round_up(pl.cdiv(Nf, 4), align))
    bytes_per_row = (2 * Df + _round_up(F, 128)) * itemsize    # x + out + padded t
    vmem_budget = 36 * 1024 * 1024                             # double-buffered tiles
    budget_cap = max(align, (vmem_budget // (2 * bytes_per_row)) // align * align)
    tm_eff = min(_round_up(tm, align), four_step_cap, budget_cap)
    tm_eff = max(align, min(tm_eff, _round_up(Nf, align)))

    grid = (pl.cdiv(Nf, tm_eff),)      # ragged last block is masked by Pallas

    vmem_limit = max(32 * 1024 * 1024,
                     int(2 * tm_eff * bytes_per_row * 1.25) + (1 << 20))

    extra = {}
    if in_place:
        # out aliases xff (x += enc); only beneficial when x is donated.
        extra["input_output_aliases"] = {0: 0}

    out = pl.pallas_call(
        _relpos_kernel,
        out_shape=jax.ShapeDtypeStruct((Nf, Df), x.dtype),
        grid_spec=pltpu.PrefetchScalarGridSpec(
            num_scalar_prefetch=0,
            grid=grid,
            in_specs=[
                pl.BlockSpec((tm_eff, Df), lambda i: (i, 0)),   # x rows (folded)
                pl.BlockSpec((tm_eff, F), lambda i: (i, 0)),    # times (folded)
                pl.BlockSpec((F, Hf), lambda i: (0, 0)),        # w1 fold (full)
                pl.BlockSpec((1, Hf), lambda i: (0, 0)),        # b1 fold (full)
                pl.BlockSpec((Hf, Df), lambda i: (0, 0)),       # w2 fold (full)
                pl.BlockSpec((1, Df), lambda i: (0, 0)),        # b2 fold (full)
            ],
            out_specs=pl.BlockSpec((tm_eff, Df), lambda i: (i, 0)),
        ),
        compiler_params=pltpu.CompilerParams(
            dimension_semantics=("parallel",),
            vmem_limit_bytes=vmem_limit),
        **extra,
    )(xff, tff, w1_f, b1_f, w2_f, b2_f)

    out = out.reshape(Nc, D)           # free row-major reshape
    if pad_rows:
        out = out[:N]                  # only in the F-ragged corner case
    return out.reshape(B, S, D)


def _reference(x, times, w1, b1, w2, b2):
    if times.ndim == 1:
        times = jnp.broadcast_to(times[None, :], x.shape[:1] + times.shape)
    t = times[..., None].astype(jnp.float32)                       # (B, S, 1)
    hp = jax.lax.Precision.HIGHEST
    h = jnp.matmul(t, w1, precision=hp) + b1
    h = h * jax.nn.sigmoid(h)
    enc = jnp.matmul(h, w2, precision=hp) + b2
    return x + enc


if __name__ == "__main__":
    # d_model=32 -> hidden=16, consistent with the module.
    D = 32
    H = D // 2

    key = jax.random.PRNGKey(0)
    kx, kt, k1, k2, k3, k4, kx2, kt2, kx3, kt3 = jax.random.split(key, 10)

    # nn.Linear-style U(-1/sqrt(fan_in), 1/sqrt(fan_in)) init.
    w1 = jax.random.uniform(k1, (1, H), jnp.float32, -1.0, 1.0)        # fan_in = 1
    b1 = jax.random.uniform(k2, (H,), jnp.float32, -1.0, 1.0)
    bound2 = 1.0 / (H ** 0.5)
    w2 = jax.random.uniform(k3, (H, D), jnp.float32, -bound2, bound2)
    b2 = jax.random.uniform(k4, (D,), jnp.float32, -bound2, bound2)

    # Fold the tiny weights once (hoisted out of any stepping loop).
    folded = fold_encoder_weights(w1, b1, w2, b2, dtype=jnp.float32)

    def check(x, times, out):
        ref = _reference(x, times, w1, b1, w2, b2)
        assert out.shape == x.shape
        # Tolerance covers possible MXU multi-pass vs. XLA precision deltas;
        # any fold/index bug produces O(1) errors and is still caught.
        assert jnp.allclose(out, ref, atol=5e-3, rtol=5e-3), "mismatch"

    # 1) Small, F-aligned batch; 2-D times; prefolded weights; single grid step.
    B, S = 2, 8
    x = jax.random.normal(kx, (B, S, D), dtype=jnp.float32)
    t = jax.random.uniform(kt, (B, S), dtype=jnp.float32)
    out = jax.block_until_ready(
        relative_positional_encoding(x, t, folded_weights=folded))
    check(x, t, out)

    # 2) Ragged: B*S = 129 is neither a multiple of the fold factor nor of the
    #    row tile; 1-D shared times; raw (unfolded) weights; multi-step grid.
    B2, S2 = 3, 43
    x2 = jax.random.normal(kx2, (B2, S2, D), dtype=jnp.float32)
    t2 = jax.random.uniform(kt2, (S2,), dtype=jnp.float32)
    out2 = jax.block_until_ready(
        relative_positional_encoding(x2, t2, w1, b1, w2, b2, tm=8))
    check(x2, t2, out2)

    # 3) F-aligned but not tile-aligned: exercises the masked ragged last
    #    block of the cdiv grid under the default (large-tile) policy.
    B3, S3 = 4, 1000
    x3 = jax.random.normal(kx3, (B3, S3, D), dtype=jnp.float32)
    t3 = jax.random.uniform(kt3, (B3, S3), dtype=jnp.float32)
    out3 = jax.block_until_ready(
        relative_positional_encoding(x3, t3, folded_weights=folded))
    check(x3, t3, out3)

    print("KERNEL_OK")
</pallas_src>

<mosaic_0001>
module attributes {stable_mosaic.version = 11 : i64} {
  func.func @_relpos_kernel(%arg0: i32, %arg1: memref<8x128xf32, #tpu.memory_space<vmem>>, %arg2: memref<8x4xf32, #tpu.memory_space<vmem>>, %arg3: memref<4x64xf32, #tpu.memory_space<vmem>>, %arg4: memref<1x64xf32, #tpu.memory_space<vmem>>, %arg5: memref<64x128xf32, #tpu.memory_space<vmem>>, %arg6: memref<1x128xf32, #tpu.memory_space<vmem>>, %arg7: memref<8x128xf32, #tpu.memory_space<vmem>>) attributes {dimension_semantics = [#tpu.dimension_semantics<parallel>], iteration_bounds = array<i64: 1>, scalar_prefetch = 0 : i64, scratch_operands = 0 : i64, tpu.core_type = #tpu.core_type<tc>, window_params = [{transform_indices = @transform_0, window_bounds = array<i64: 8, 128>}, {transform_indices = @transform_1, window_bounds = array<i64: 8, 4>}, {pipeline_mode = #tpu.pipeline_mode<synchronous>, transform_indices = @transform_2, window_bounds = array<i64: 4, 64>}, {pipeline_mode = #tpu.pipeline_mode<synchronous>, transform_indices = @transform_3, window_bounds = array<i64: 1, 64>}, {pipeline_mode = #tpu.pipeline_mode<synchronous>, transform_indices = @transform_4, window_bounds = array<i64: 64, 128>}, {pipeline_mode = #tpu.pipeline_mode<synchronous>, transform_indices = @transform_5, window_bounds = array<i64: 1, 128>}, {transform_indices = @transform_6, window_bounds = array<i64: 8, 128>}]} {
    %c0 = arith.constant 0 : index
    %c0_0 = arith.constant 0 : index
    %0 = vector.load %arg2[%c0, %c0_0] : memref<8x4xf32, #tpu.memory_space<vmem>>, vector<8x4xf32>
    %c0_1 = arith.constant 0 : index
    %c0_2 = arith.constant 0 : index
    %1 = vector.load %arg3[%c0_1, %c0_2] : memref<4x64xf32, #tpu.memory_space<vmem>>, vector<4x64xf32>
    %cst = arith.constant dense<0.000000e+00> : vector<8x64xf32>
    %2 = tpu.matmul %0, %1, %cst {dimension_numbers = #tpu.dot_dimension_numbers<[1], [0], [0], [1], [0, 0, 1, 1], [], []>} : vector<8x4xf32>, vector<4x64xf32>, vector<8x64xf32> -> vector<8x64xf32>
    %c0_3 = arith.constant 0 : index
    %c0_4 = arith.constant 0 : index
    %3 = vector.load %arg4[%c0_3, %c0_4] : memref<1x64xf32, #tpu.memory_space<vmem>>, vector<1x64xf32>
    %4 = vector.broadcast %3 : vector<1x64xf32> to vector<8x64xf32>
    %5 = arith.addf %2, %4 : vector<8x64xf32>
    %6 = arith.negf %5 : vector<8x64xf32>
    %7 = math.exp %6 : vector<8x64xf32>
    %cst_5 = arith.constant 1.000000e+00 : f32
    %8 = vector.broadcast %cst_5 : f32 to vector<8x64xf32>
    %9 = arith.addf %8, %7 : vector<8x64xf32>
    %10 = arith.divf %8, %9 : vector<8x64xf32>
    %11 = arith.mulf %5, %10 : vector<8x64xf32>
    %c0_6 = arith.constant 0 : index
    %c0_7 = arith.constant 0 : index
    %12 = vector.load %arg5[%c0_6, %c0_7] : memref<64x128xf32, #tpu.memory_space<vmem>>, vector<64x128xf32>
    %cst_8 = arith.constant dense<0.000000e+00> : vector<8x128xf32>
    %13 = tpu.matmul %11, %12, %cst_8 {dimension_numbers = #tpu.dot_dimension_numbers<[1], [0], [0], [1], [0, 0, 1, 1], [], []>} : vector<8x64xf32>, vector<64x128xf32>, vector<8x128xf32> -> vector<8x128xf32>
    %c0_9 = arith.constant 0 : index
    %c0_10 = arith.constant 0 : index
    %14 = vector.load %arg6[%c0_9, %c0_10] : memref<1x128xf32, #tpu.memory_space<vmem>>, vector<1x128xf32>
    %15 = vector.broadcast %14 : vector<1x128xf32> to vector<8x128xf32>
    %16 = arith.addf %13, %15 : vector<8x128xf32>
    %c0_11 = arith.constant 0 : index
    %c0_12 = arith.constant 0 : index
    %17 = vector.load %arg1[%c0_11, %c0_12] : memref<8x128xf32, #tpu.memory_space<vmem>>, vector<8x128xf32>
    %18 = arith.addf %17, %16 : vector<8x128xf32>
    %c0_13 = arith.constant 0 : index
    %c0_14 = arith.constant 0 : index
    %19 = vector.load %arg7[%c0_13, %c0_14] : memref<8x128xf32, #tpu.memory_space<vmem>>, vector<8x128xf32>
    tpu.vector_store %arg7[%c0_13, %c0_14], %18 {strides = array<i32>} : memref<8x128xf32, #tpu.memory_space<vmem>>, vector<8x128xf32>,
    return
  }
  func.func @transform_0(%arg0: i32) -> (i32, i32) {
    %c0_i32 = arith.constant 0 : i32
    %c0_i32_0 = arith.constant 0 : i32
    return %arg0, %c0_i32 : i32, i32
  }
  func.func @transform_1(%arg0: i32) -> (i32, i32) {
    %c0_i32 = arith.constant 0 : i32
    %c0_i32_0 = arith.constant 0 : i32
    return %arg0, %c0_i32 : i32, i32
  }
  func.func @transform_2(%arg0: i32) -> (i32, i32) {
    %c0_i32 = arith.constant 0 : i32
    %c0_i32_0 = arith.constant 0 : i32
    %c0_i32_1 = arith.constant 0 : i32
    return %c0_i32, %c0_i32_0 : i32, i32
  }
  func.func @transform_3(%arg0: i32) -> (i32, i32) {
    %c0_i32 = arith.constant 0 : i32
    %c0_i32_0 = arith.constant 0 : i32
    %c0_i32_1 = arith.constant 0 : i32
    return %c0_i32, %c0_i32_0 : i32, i32
  }
  func.func @transform_4(%arg0: i32) -> (i32, i32) {
    %c0_i32 = arith.constant 0 : i32
    %c0_i32_0 = arith.constant 0 : i32
    %c0_i32_1 = arith.constant 0 : i32
    return %c0_i32, %c0_i32_0 : i32, i32
  }
  func.func @transform_5(%arg0: i32) -> (i32, i32) {
    %c0_i32 = arith.constant 0 : i32
    %c0_i32_0 = arith.constant 0 : i32
    %c0_i32_1 = arith.constant 0 : i32
    return %c0_i32, %c0_i32_0 : i32, i32
  }
  func.func @transform_6(%arg0: i32) -> (i32, i32) {
    %c0_i32 = arith.constant 0 : i32
    %c0_i32_0 = arith.constant 0 : i32
    return %arg0, %c0_i32 : i32, i32
  }
}

</mosaic_0001>

<bundles_post_ra>
// kernel: tpu_custom_call.1
= control target key start
LH: loop header
LB: loop body
LE: loop exit
PB: predicated region body
PF: predicated region fallthrough
CT: control target
= control target key end

     0   :  { %11 = vsyncpa [#allocation3], 0  ;;  %s550_s0 = inlined_call_operand.hbm [shape: f32[4,128], index: 0, kind: input, shape index: {}]   ;;  %s551_s1 = inlined_call_operand.hbm [shape: f32[4,4], index: 1, kind: input, shape index: {}]   ;;  %s552_s2 = inlined_call_operand.vmem [shape: f32[4,64], index: 2, kind: input, shape index: {}]   ;;  %s553_s3 = inlined_call_operand.vmem [shape: f32[1,64], index: 3, kind: input, shape index: {}]   ;;  %s554_s4 = inlined_call_operand.hbm [shape: f32[64,128], index: 4, kind: input, shape index: {}]   ;;  %s555_s5 = inlined_call_operand.vmem [shape: f32[1,128], index: 5, kind: input, shape index: {}]   ;;  %s556_s6 = inlined_call_operand.hbm [shape: f32[4,128], index: 6, kind: output, shape index: {}]  }
   0x1   :  { %12 = vsyncpa [#allocation6], 0 }
   0x2   :  { %13 = vsyncpa [#allocation4], 0 }
   0x3   :  { %18 = vsyncadd [#allocation3], 64  ;;  %s431_s21 = smov [#allocation2]   ;;  %s337_s25 = scalar_lea.hbm %s550_s0, 64 }
   0x4   :  { %s19_s22 = sshll.u32 %s431_s21, 4  ;;  %p338_p0 = scmp.ne.s32.totalorder %s550_s0, %s337_s25  ;;  %s20_s22 = int_to_ptr.vmem [resolvable:$true] %s19_s22 }
   0x5   :  { %p341_p1 = scmp.lt.u32.totalorder %s337_s25, %s550_s0 }
   0x7   :  { %p343_p2 = pnand %p341_p1, %p338_p0 }
   0x9   :  { %346 = shalt.err (!%p343_p2)
}
   0xa   :  { %s347_s30 = scalar_lea.vmem %s20_s22, 64  ;;  %s351_s7 = scalar_lea.vmem %s20_s22, 128 }
   0xb   :  { %p348_p3 = scmp.ne.s32.totalorder %s20_s22, %s347_s30  ;;  %p352_p4 = scmp.lt.s32.totalorder %s20_s22, %s20_s22 }
   0xc   :  { %p353_p5 = scmp.lt.s32.totalorder %s351_s7, %s347_s30 }
   0xe   :  { %p354_p6 = por %p353_p5, %p352_p4 }
  0x10   :  { %p355_p7 = pnand %p354_p6, %p348_p3 }
  0x12   :  { %358 = shalt.err (!%p355_p7)
}
  0x13   :  { %s432_s8 = smov 64   ;;  %s433_s9 = smov 4  }
  0x14   :  { %25 = dma.hbm_to_vmem [thread:$0]  %s550_s0, 64, %s20_s22, [#allocation3], %s432_s8, %s432_s8, %s433_s9  }
  0x15   :  { %30 = vsyncadd [#allocation6], 64  ;;  %s434_s12 = smov [#allocation5]   ;;  %s435_s14 = smov [#allocation7]  }
  0x16   :  { %s31_s13 = sshll.u32 %s434_s12, 4  ;;  %s47_s15 = sshll.u32 %s435_s14, 4  ;;  %s32_s13 = int_to_ptr.vmem [resolvable:$true] %s31_s13  ;;  %s492_s15 = int_to_ptr.vmem [resolvable:$true] %s47_s15 }
  0x17   :  { %s359_s18 = scalar_lea.hbm %s551_s1, 64 }
  0x18   :  { %p360_p8 = scmp.ne.s32.totalorder %s551_s1, %s359_s18  ;;  %p363_p9 = scmp.lt.u32.totalorder %s359_s18, %s551_s1 }
  0x1a   :  { %p365_p10 = pnand %p363_p9, %p360_p8 }
  0x1c   :  { %368 = shalt.err (!%p365_p10)
}
  0x1d   :  { %s369_s0 = scalar_lea.vmem %s32_s13, 64  ;;  %s373_s22 = scalar_lea.vmem %s32_s13, 128 }
  0x1e   :  { %p370_p11 = scmp.ne.s32.totalorder %s32_s13, %s369_s0  ;;  %p374_p12 = scmp.lt.s32.totalorder %s32_s13, %s32_s13 }
  0x1f   :  { %p375_p13 = scmp.lt.s32.totalorder %s373_s22, %s369_s0 }
  0x21   :  { %p376_p0 = por %p375_p13, %p374_p12 }
  0x23   :  { %p377_p1 = pnand %p376_p0, %p370_p11 }
  0x25   :  { %380 = shalt.err (!%p377_p1)
}
  0x26   :  { %37 = dma.hbm_to_vmem [thread:$0]  %s551_s1, 64, %s32_s13, [#allocation6], %s432_s8, %s432_s8, %s433_s9  }
  0x27   :  { %s381_s28 = scalar_lea.hbm %s554_s4, 1024 }
  0x28   :  { %p382_p2 = scmp.ne.s32.totalorder %s554_s4, %s381_s28  ;;  %p385_p3 = scmp.lt.u32.totalorder %s381_s28, %s554_s4 }
  0x2a   :  { %p387_p4 = pnand %p385_p3, %p382_p2 }
  0x2c   :  { %390 = shalt.err (!%p387_p4)
}
  0x2d   :  { %s391_s11 = scalar_lea.vmem %s492_s15, 1024  ;;  %p396_p6 = scmp.lt.s32.totalorder %s492_s15, %s492_s15 }
  0x2e   :  { %p392_p5 = scmp.ne.s32.totalorder %s492_s15, %s391_s11  ;;  %p397_p7 = scmp.lt.s32.totalorder %s391_s11, %s391_s11 }
  0x30   :  { %p398_p8 = por %p397_p7, %p396_p6 }
  0x32   :  { %p399_p9 = pnand %p398_p8, %p392_p5 }
  0x34   :  { %402 = shalt.err (!%p399_p9)
}
  0x35   :  { %s436_s1 = smov 128   ;;  %s437_s12 = smov 8  }
  0x36   :  { %53 = dma.hbm_to_vmem [thread:$0]  %s554_s4, 1024, %s492_s15, [#allocation6], %s436_s1, %s436_s1, %s437_s12  }
  0x37   :  { %425 = dma.done.wait [#allocation3], 128  }
  0x38   :  { %426 = vsyncadd [#allocation3], 4294967168 }
  0x39   :  { %427 = dma.done.wait [#allocation6], 1152  }
  0x3a   :  { %428 = vsyncadd [#allocation6], 4294966144  ;;  %v438_v0 = vmov 0.0   ;;  %vm439_vm0 = vmmov 0   ;;  %vm78_vm1 = vcmask 1043456   ;;  %vm74_vm2 = vcmask 31744  }
  0x3b   :  { %286 = vmatprep.subr.mxu0 %v438_v0  ;;  %288 = vmatprep.mubr.msk.f32.mxu0 %vm439_vm0, %v438_v0  ;;  %v66_v1 = vld [vmem:[%s552_s2] sm:$0xf]  ;;  %v65_v2 = vld [vmem:[#allocation5] sm:$0xff]  ;;  %v159_v3 = vld [vmem:[#allocation7] sm:$0xff]  ;;  %v440_v6 = vmov 0.0|0.0   ;;  %vm174_vm3 = vcmask 523264  }
  0x3c   :  { %307 = vmatprep.mubr.msk.f32.mxu1 %vm439_vm0, %v438_v0  ;;  %287 = vmatpush3.msk.msra.mxu0 %vm78_vm1, %v66_v1  ;;  %v160_v4 = vld [vmem:[#allocation7 + $0x8] sm:$0xff]  ;;  %v161_v7 = vld [vmem:[#allocation7 + $0x10] sm:$0xff]  ;;  %v162_v8 = vld [vmem:[#allocation7 + $0x18] sm:$0xff] }
  0x3d   :  { %289 = vmatmul.mubr.msk.f32.vlgmr.msra.gmra.mrb[0].mxu0 %vm74_vm2, %v65_v2  ;;  %v311_v5 = vpack.c.bf16 %v160_v4, %v159_v3  ;;  %310 = vmatprep.subr.bf16.mxu1 %v440_v6  ;;  %v314_v9 = vpack.c.bf16 %v162_v8, %v161_v7  ;;  %v163_v10 = vld [vmem:[#allocation7 + $0x20] sm:$0xff]  ;;  %v164_v11 = vld [vmem:[#allocation7 + $0x28] sm:$0xff]  ;;  %v165_v13 = vld [vmem:[#allocation7 + $0x30] sm:$0xff] }
  0x3e   :  { %v317_v12 = vpack.c.bf16 %v164_v11, %v163_v10  ;;  %v166_v14 = vld [vmem:[#allocation7 + $0x38] sm:$0xff]  ;;  %v269_v16 = vld [vmem:[%s553_s3] ss:$0 sm:$0xff] }
  0x3f   :  { %312 = vmatpush3.bf16.msra.mxu1 %v311_v5  ;;  %v320_v15 = vpack.c.bf16 %v166_v14, %v165_v13  ;;  %v273_v25 = vld [vmem:[%s555_s5] ss:$0 sm:$0xff] }
  0x40   :  { %313 = vmatprep.subr.bf16.mxu1 %v440_v6  ;;  %v248_v27 = vld [vmem:[#allocation2] sm:$0xff] }
  0x43   :  { %315 = vmatpush3.bf16.msra.mxu1 %v314_v9 }
  0x44   :  { %316 = vmatprep.subr.bf16.mxu1 %v440_v6 }
  0x47   :  { %318 = vmatpush3.bf16.msra.mxu1 %v317_v12 }
  0x48   :  { %319 = vmatprep.subr.bf16.mxu1 %v440_v6 }
  0x4b   :  { %321 = vmatpush3.bf16.msra.mxu1 %v320_v15 }
 0x110   :  { %v148_v17 = vpop.f32.mrb[0].mxu0 }
 0x111   :  { %v149_v18 = vadd.f32 %v269_v16, %v148_v17  ;;  %v290_v19 = vpop.f32.mrb[1].mxu0 }
 0x113   :  { %v272_v20 = vmul.f32 -1.442695, %v149_v18 }
 0x115   :  { %333 = vpow2.f32 %v272_v20 }
 0x11f   :  { %v334_v21 = vpop.eup %333 }
 0x120   :  { %v155_v22 = vadd.f32 1.0, %v334_v21 }
 0x122   :  { %335 = vrcp.f32 %v155_v22 }
 0x12c   :  { %v336_v23 = vpop.eup %335 }
 0x12d   :  { %v158_v24 = vmul.f32 %v336_v23, %v149_v18 }
 0x12f   :  { %308 = vmatmul.mubr.msk.f32.vlgmr.msra.gmra.mrb[0].mxu1 %vm174_vm3, %v158_v24 }
 0x202   :  { %v244_v26 = vpop.f32.mrb[0].mxu1 }
 0x203   :  { %v245_v28 = vadd.f32 %v273_v25, %v244_v26  ;;  %v309_v29 = vpop.f32.mrb[1].mxu1 }
 0x205   :  { %v249_v30 = vadd.f32 %v248_v27, %v245_v28 }
 0x207   :  { %250 = vst [vmem:[#allocation8] sm:$0xff] %v249_v30 }
 0x208   :  { %255 = vsyncadd [#allocation4], 64  ;;  %s441_s3 = smov [#allocation8]  }
 0x209   :  { %s256_s19 = sshll.u32 %s441_s3, 4  ;;  %s257_s19 = int_to_ptr.vmem [resolvable:$true] %s256_s19 }
 0x20a   :  { %s403_s20 = scalar_lea.vmem %s257_s19, 64  ;;  %s407_s21 = scalar_lea.vmem %s257_s19, 128 }
 0x20b   :  { %p404_p10 = scmp.ne.s32.totalorder %s257_s19, %s403_s20  ;;  %p408_p11 = scmp.lt.s32.totalorder %s257_s19, %s257_s19 }
 0x20c   :  { %p409_p12 = scmp.lt.s32.totalorder %s407_s21, %s403_s20 }
 0x20e   :  { %p410_p13 = por %p409_p12, %p408_p11 }
 0x210   :  { %p411_p0 = pnand %p410_p13, %p404_p10 }
 0x212   :  { %414 = shalt.err (!%p411_p0)
}
 0x213   :  { %s415_s0 = scalar_lea.hbm %s556_s6, 64 }
 0x214   :  { %p416_p1 = scmp.ne.s32.totalorder %s556_s6, %s415_s0  ;;  %p419_p2 = scmp.lt.u32.totalorder %s415_s0, %s556_s6 }
 0x216   :  { %p421_p3 = pnand %p419_p2, %p416_p1 }
 0x218   :  { %424 = shalt.err (!%p421_p3)
}
 0x219   :  { %262 = dma.vmem_to_hbm [thread:$0]  %s257_s19, 64, %s556_s6, [#allocation4], %s432_s8, %s432_s8, %s433_s9  }
 0x21a   :  { %429 = dma.done.wait [#allocation4], 128  }
 0x21b   :  { %430 = vsyncadd [#allocation4], 4294967168 }
 0x21c   :  { %266 = vsyncpa [#allocation3], 1 }
 0x21d   :  { %267 = vsyncpa [#allocation6], 1 }
 0x21e   :  { %268 = vsyncpa [#allocation4], 1 }

</bundles_post_ra>
